<compile_context>
chip_gen: v5e
topology: v5e:2x2
jax: 0.10.0
libtpu: 0.0.40
codegen_flags: <defaults>
</compile_context>

<pallas_src>
import jax
import jax.numpy as jnp
from jax.experimental import pallas as pl
from jax.experimental.pallas import tpu as pltpu


def _round_up(x, m):
    return ((x + m - 1) // m) * m


def _tpu_config():
    """Generation-aware VMEM cap / tile defaults (v7x: 64 MiB, 2 TCs; v5e/v6e: 128 MiB, 1 TC)."""
    vmem_phys = 128 << 20
    try:
        info = pltpu.get_tpu_info()
        vmem_phys = int(getattr(info, "vmem_capacity_bytes", vmem_phys))
    except Exception:
        pass
    kind = ""
    try:
        kind = jax.devices()[0].device_kind.lower()
    except Exception:
        pass
    small_vmem = vmem_phys <= (64 << 20)
    is_v7x = ("v7" in kind) or ("tpu7" in kind) or small_vmem
    # Leave headroom below physical VMEM for Mosaic internal scratch.
    vmem_cap = max(min(int(vmem_phys * 0.85), vmem_phys - (8 << 20)), 32 << 20)
    return {"vmem_cap": vmem_cap,
            "block_rows": 256 if is_v7x else 512,
            "two_cores": is_v7x}


def _pick_dff_tile(df_p, preferred):
    if preferred is not None:
        preferred = _round_up(int(preferred), 128)
        if preferred <= df_p and df_p % preferred == 0:
            return preferred
    for cand in (2048, 1024, 512, 256, 128):
        if cand <= df_p and df_p % cand == 0:
            return cand
    return df_p


def _ffn_resident_kernel(x_ref, w1_ref, b1_ref, w2_ref, b2_ref, o_ref, h_ref):
    comp_dt = w1_ref.dtype
    x = x_ref[...].astype(comp_dt)                  # per-tile cast, hidden under the matmuls
    h = jnp.dot(x, w1_ref[...], preferred_element_type=jnp.float32)
    h = jnp.maximum(h + b1_ref[...], 0.0)           # bias + ReLU in f32 (v5e-friendly)
    # TODO(synk): training-mode dropout (p=0.1) omitted; eval-mode dropout is identity.
    h_ref[...] = h.astype(comp_dt)                  # single live (tm, df_p) activation buffer
    y = jnp.dot(h_ref[...], w2_ref[...], preferred_element_type=jnp.float32)
    o_ref[...] = (y + b2_ref[...]).astype(o_ref.dtype)


def _ffn_dff_tiled_kernel(x_ref, w1_ref, b1_ref, w2_ref, b2_ref, o_ref, acc_ref):
    k = pl.program_id(1)

    @pl.when(k == 0)
    def _():
        acc_ref[...] = jnp.zeros_like(acc_ref)

    comp_dt = w1_ref.dtype
    x = x_ref[...].astype(comp_dt)
    h = jnp.dot(x, w1_ref[...], preferred_element_type=jnp.float32)   # (tm, tf)
    h = jnp.maximum(h + b1_ref[...], 0.0)
    # TODO(synk): training-mode dropout (p=0.1) omitted; eval-mode dropout is identity.
    acc_ref[...] += jnp.dot(h.astype(comp_dt), w2_ref[...],
                            preferred_element_type=jnp.float32)

    @pl.when(k == pl.num_programs(1) - 1)
    def _():
        o_ref[...] = (acc_ref[...] + b2_ref[...]).astype(o_ref.dtype)


def positionwise_ffn(x, w1, b1, w2, b2, *, compute_dtype=jnp.bfloat16,
                     block_rows=None, dff_tile=None, force_dff_tile=False):
    """x: (batch, seq, d_model) -> (batch, seq, d_model).

    w1: (d_model, d_ff), w2: (d_ff, d_model) (pre-transposed vs torch.nn.Linear).
    compute_dtype: MXU input dtype (default bf16; accumulation is always f32).
    """
    batch, seq, d_model = x.shape
    d_ff = w1.shape[1]
    n = batch * seq

    cfg = _tpu_config()
    if block_rows is None:
        block_rows = cfg["block_rows"]
        if not cfg["two_cores"] and d_ff <= 2048:
            block_rows = max(block_rows, 1024)

    comp_dt = jnp.dtype(x.dtype) if compute_dtype is None else jnp.dtype(compute_dtype)
    comp_item = comp_dt.itemsize
    x_item = jnp.dtype(x.dtype).itemsize
    out_item = x_item

    dm_p = _round_up(d_model, 128)
    df_p = _round_up(d_ff, 128)

    # Token tile: always a multiple of 8; on v7x keep >= 2 tiles so both TensorCores get work.
    tm = _round_up(min(block_rows, n), 8)
    if cfg["two_cores"] and n >= 16:
        tm = min(tm, _round_up((n + 1) // 2, 8))
    n_pad = _round_up(n, tm)
    grid_m = n_pad // tm

    # Zero padding is semantics-preserving; skipped when already aligned. x stays in native
    # dtype (cast happens per tile inside the kernel -> no extra HBM pass over x).
    x2d = x.reshape(n, d_model)
    if (n_pad != n) or (dm_p != d_model):
        x2d = jnp.pad(x2d, ((0, n_pad - n), (0, dm_p - d_model)))
    w1_p = jnp.pad(w1, ((0, dm_p - d_model), (0, df_p - d_ff))).astype(comp_dt)
    w2_p = jnp.pad(w2, ((0, df_p - d_ff), (0, dm_p - d_model))).astype(comp_dt)
    b1_p = jnp.pad(b1, (0, df_p - d_ff)).astype(jnp.float32).reshape(1, df_p)
    b2_p = jnp.pad(b2, (0, dm_p - d_model)).astype(jnp.float32).reshape(1, dm_p)

    headroom = 6 << 20
    weight_bytes = (dm_p * df_p + df_p * dm_p) * comp_item + (df_p + dm_p) * 4
    stream_bytes = 2 * tm * dm_p * (x_item + out_item)            # double-buffered x / out tiles
    act_bytes = tm * df_p * (4 + comp_item) + tm * dm_p * 4       # f32 h + cast copy + f32 y
    resident_need = weight_bytes + stream_bytes + act_bytes + headroom

    cost = pl.CostEstimate(
        flops=4 * n_pad * dm_p * df_p,                            # two matmuls: 2*n*dm*df each
        transcendentals=0,
        bytes_accessed=n_pad * dm_p * (x_item + out_item) + weight_bytes,
    )

    use_dff_tile = force_dff_tile or (resident_need > cfg["vmem_cap"])

    if not use_dff_tile:
        vmem_limit = min(max(resident_need, 32 << 20), cfg["vmem_cap"])
        out = pl.pallas_call(
            _ffn_resident_kernel,
            out_shape=jax.ShapeDtypeStruct((n_pad, dm_p), x.dtype),
            grid_spec=pltpu.PrefetchScalarGridSpec(
                num_scalar_prefetch=0,
                grid=(grid_m,),
                in_specs=[
                    pl.BlockSpec((tm, dm_p), lambda i: (i, 0)),          # x: streamed per tile
                    pl.BlockSpec((dm_p, df_p), lambda i: (0, 0),
                                 pipeline_mode=pl.Buffered(1)),          # w1: resident, 1-buffered
                    pl.BlockSpec((1, df_p), lambda i: (0, 0),
                                 pipeline_mode=pl.Buffered(1)),          # b1: resident
                    pl.BlockSpec((df_p, dm_p), lambda i: (0, 0),
                                 pipeline_mode=pl.Buffered(1)),          # w2: resident
                    pl.BlockSpec((1, dm_p), lambda i: (0, 0),
                                 pipeline_mode=pl.Buffered(1)),          # b2: resident
                ],
                out_specs=pl.BlockSpec((tm, dm_p), lambda i: (i, 0)),
                scratch_shapes=[pltpu.VMEM((tm, df_p), comp_dt)],        # cast hidden activation
            ),
            compiler_params=pltpu.CompilerParams(
                dimension_semantics=("parallel",),
                vmem_limit_bytes=int(vmem_limit),
            ),
            cost_estimate=cost,
        )(x2d, w1_p, b1_p, w2_p, b2_p)
    else:
        tf = _pick_dff_tile(df_p, dff_tile)
        tiled_need = (2 * (dm_p * tf + tf * dm_p) * comp_item + 2 * tf * 4 + dm_p * 4
                      + 2 * tm * dm_p * (x_item + out_item)
                      + tm * dm_p * 4                                    # f32 accumulator
                      + tm * tf * (4 + comp_item)                        # f32 h chunk + cast copy
                      + headroom)
        vmem_limit = min(max(tiled_need, 32 << 20), cfg["vmem_cap"])
        out = pl.pallas_call(
            _ffn_dff_tiled_kernel,
            out_shape=jax.ShapeDtypeStruct((n_pad, dm_p), x.dtype),
            grid_spec=pltpu.PrefetchScalarGridSpec(
                num_scalar_prefetch=0,
                grid=(grid_m, df_p // tf),
                in_specs=[
                    pl.BlockSpec((tm, dm_p), lambda i, k: (i, 0)),       # x: reused across k
                    pl.BlockSpec((dm_p, tf), lambda i, k: (0, k)),       # w1 chunk: streamed
                    pl.BlockSpec((1, tf), lambda i, k: (0, k)),          # b1 chunk
                    pl.BlockSpec((tf, dm_p), lambda i, k: (k, 0)),       # w2 chunk: streamed
                    pl.BlockSpec((1, dm_p), lambda i, k: (0, 0),
                                 pipeline_mode=pl.Buffered(1)),          # b2: grid-invariant
                ],
                out_specs=pl.BlockSpec((tm, dm_p), lambda i, k: (i, 0)),
                scratch_shapes=[pltpu.VMEM((tm, dm_p), jnp.float32)],    # output accumulator
            ),
            compiler_params=pltpu.CompilerParams(
                dimension_semantics=("parallel", "arbitrary"),
                vmem_limit_bytes=int(vmem_limit),
            ),
            cost_estimate=cost,
        )(x2d, w1_p, b1_p, w2_p, b2_p)

    return out[:n, :d_model].reshape(batch, seq, d_model)


def reference_ffn(x, w1, b1, w2, b2):
    h = jnp.maximum(jnp.einsum("bsd,df->bsf", x, w1) + b1, 0.0)
    return jnp.einsum("bsf,fd->bsd", h, w2) + b2


if __name__ == "__main__":
    # Small shapes consistent with the module's forward.
    batch, seq, d_model, d_ff = 2, 8, 32, 64

    key = jax.random.PRNGKey(0)
    kx, k1, k2, k3, k4, k5, k6, k7, k8 = jax.random.split(key, 9)

    x = jax.random.normal(kx, (batch, seq, d_model), dtype=jnp.float32)
    w1 = jax.random.normal(k1, (d_model, d_ff), dtype=jnp.float32) * 0.05
    b1 = jax.random.normal(k2, (d_ff,), dtype=jnp.float32) * 0.01
    w2 = jax.random.normal(k3, (d_ff, d_model), dtype=jnp.float32) * 0.05
    b2 = jax.random.normal(k4, (d_model,), dtype=jnp.float32) * 0.01

    y_ref = reference_ffn(x, w1, b1, w2, b2)

    # f32-MXU resident path: bit-close to the pure-JAX reference.
    y_f32 = jax.block_until_ready(
        positionwise_ffn(x, w1, b1, w2, b2, compute_dtype=jnp.float32))
    assert y_f32.shape == (batch, seq, d_model)
    assert jnp.allclose(y_f32, y_ref, atol=1e-5, rtol=1e-5)

    # Default bf16-MXU path (f32 accumulation): full MXU rate, looser tolerance.
    y_bf16 = jax.block_until_ready(positionwise_ffn(x, w1, b1, w2, b2))
    assert y_bf16.shape == (batch, seq, d_model)
    assert jnp.allclose(y_bf16, y_ref, atol=5e-2, rtol=5e-2)

    # d_ff-tiled reduction path (the v7x large-FFN fallback), forced + multi-step k.
    d_ff2 = 256
    w1b = jax.random.normal(k5, (d_model, d_ff2), dtype=jnp.float32) * 0.05
    b1b = jax.random.normal(k6, (d_ff2,), dtype=jnp.float32) * 0.01
    w2b = jax.random.normal(k7, (d_ff2, d_model), dtype=jnp.float32) * 0.05
    b2b = jax.random.normal(k8, (d_model,), dtype=jnp.float32) * 0.01
    y_tiled = jax.block_until_ready(
        positionwise_ffn(x, w1b, b1b, w2b, b2b, compute_dtype=jnp.float32,
                         force_dff_tile=True, dff_tile=128))
    y_tiled_ref = reference_ffn(x, w1b, b1b, w2b, b2b)
    assert y_tiled.shape == (batch, seq, d_model)
    assert jnp.allclose(y_tiled, y_tiled_ref, atol=1e-5, rtol=1e-5)

    print("KERNEL_OK")
</pallas_src>

<mosaic_0001>
module attributes {stable_mosaic.version = 11 : i64} {
  func.func @_ffn_resident_kernel(%arg0: i32, %arg1: memref<16x128xf32, #tpu.memory_space<vmem>>, %arg2: memref<128x128xf32, #tpu.memory_space<vmem>>, %arg3: memref<1x128xf32, #tpu.memory_space<vmem>>, %arg4: memref<128x128xf32, #tpu.memory_space<vmem>>, %arg5: memref<1x128xf32, #tpu.memory_space<vmem>>, %arg6: memref<16x128xf32, #tpu.memory_space<vmem>>, %arg7: memref<16x128xf32, #tpu.memory_space<vmem>>) attributes {dimension_semantics = [#tpu.dimension_semantics<parallel>], iteration_bounds = array<i64: 1>, scalar_prefetch = 0 : i64, scratch_operands = 1 : i64, tpu.core_type = #tpu.core_type<tc>, window_params = [{transform_indices = @transform_0, window_bounds = array<i64: 16, 128>}, {pipeline_mode = #tpu.pipeline_mode<synchronous>, transform_indices = @transform_1, window_bounds = array<i64: 128, 128>}, {pipeline_mode = #tpu.pipeline_mode<synchronous>, transform_indices = @transform_2, window_bounds = array<i64: 1, 128>}, {pipeline_mode = #tpu.pipeline_mode<synchronous>, transform_indices = @transform_3, window_bounds = array<i64: 128, 128>}, {pipeline_mode = #tpu.pipeline_mode<synchronous>, transform_indices = @transform_4, window_bounds = array<i64: 1, 128>}, {transform_indices = @transform_5, window_bounds = array<i64: 16, 128>}]} {
    %c0 = arith.constant 0 : index
    %c0_0 = arith.constant 0 : index
    %0 = vector.load %arg1[%c0, %c0_0] : memref<16x128xf32, #tpu.memory_space<vmem>>, vector<16x128xf32>
    %c0_1 = arith.constant 0 : index
    %c0_2 = arith.constant 0 : index
    %1 = vector.load %arg2[%c0_1, %c0_2] : memref<128x128xf32, #tpu.memory_space<vmem>>, vector<128x128xf32>
    %cst = arith.constant dense<0.000000e+00> : vector<16x128xf32>
    %2 = tpu.matmul %0, %1, %cst {dimension_numbers = #tpu.dot_dimension_numbers<[1], [0], [0], [1], [0, 0, 1, 1], [], []>} : vector<16x128xf32>, vector<128x128xf32>, vector<16x128xf32> -> vector<16x128xf32>
    %c0_3 = arith.constant 0 : index
    %c0_4 = arith.constant 0 : index
    %3 = vector.load %arg3[%c0_3, %c0_4] : memref<1x128xf32, #tpu.memory_space<vmem>>, vector<1x128xf32>
    %4 = vector.broadcast %3 : vector<1x128xf32> to vector<16x128xf32>
    %5 = arith.addf %2, %4 : vector<16x128xf32>
    %cst_5 = arith.constant 0.000000e+00 : f32
    %6 = vector.broadcast %cst_5 : f32 to vector<16x128xf32>
    %7 = arith.maximumf %5, %6 : vector<16x128xf32>
    %c0_6 = arith.constant 0 : index
    %c0_7 = arith.constant 0 : index
    %8 = vector.load %arg7[%c0_6, %c0_7] : memref<16x128xf32, #tpu.memory_space<vmem>>, vector<16x128xf32>
    tpu.vector_store %arg7[%c0_6, %c0_7], %7 {strides = array<i32>} : memref<16x128xf32, #tpu.memory_space<vmem>>, vector<16x128xf32>,
    %c0_8 = arith.constant 0 : index
    %c0_9 = arith.constant 0 : index
    %9 = vector.load %arg7[%c0_8, %c0_9] : memref<16x128xf32, #tpu.memory_space<vmem>>, vector<16x128xf32>
    %c0_10 = arith.constant 0 : index
    %c0_11 = arith.constant 0 : index
    %10 = vector.load %arg4[%c0_10, %c0_11] : memref<128x128xf32, #tpu.memory_space<vmem>>, vector<128x128xf32>
    %cst_12 = arith.constant dense<0.000000e+00> : vector<16x128xf32>
    %11 = tpu.matmul %9, %10, %cst_12 {dimension_numbers = #tpu.dot_dimension_numbers<[1], [0], [0], [1], [0, 0, 1, 1], [], []>} : vector<16x128xf32>, vector<128x128xf32>, vector<16x128xf32> -> vector<16x128xf32>
    %c0_13 = arith.constant 0 : index
    %c0_14 = arith.constant 0 : index
    %12 = vector.load %arg5[%c0_13, %c0_14] : memref<1x128xf32, #tpu.memory_space<vmem>>, vector<1x128xf32>
    %13 = vector.broadcast %12 : vector<1x128xf32> to vector<16x128xf32>
    %14 = arith.addf %11, %13 : vector<16x128xf32>
    %c0_15 = arith.constant 0 : index
    %c0_16 = arith.constant 0 : index
    %15 = vector.load %arg6[%c0_15, %c0_16] : memref<16x128xf32, #tpu.memory_space<vmem>>, vector<16x128xf32>
    tpu.vector_store %arg6[%c0_15, %c0_16], %14 {strides = array<i32>} : memref<16x128xf32, #tpu.memory_space<vmem>>, vector<16x128xf32>,
    return
  }
  func.func @transform_0(%arg0: i32) -> (i32, i32) {
    %c0_i32 = arith.constant 0 : i32
    %c0_i32_0 = arith.constant 0 : i32
    return %arg0, %c0_i32 : i32, i32
  }
  func.func @transform_1(%arg0: i32) -> (i32, i32) {
    %c0_i32 = arith.constant 0 : i32
    %c0_i32_0 = arith.constant 0 : i32
    %c0_i32_1 = arith.constant 0 : i32
    return %c0_i32, %c0_i32_0 : i32, i32
  }
  func.func @transform_2(%arg0: i32) -> (i32, i32) {
    %c0_i32 = arith.constant 0 : i32
    %c0_i32_0 = arith.constant 0 : i32
    %c0_i32_1 = arith.constant 0 : i32
    return %c0_i32, %c0_i32_0 : i32, i32
  }
  func.func @transform_3(%arg0: i32) -> (i32, i32) {
    %c0_i32 = arith.constant 0 : i32
    %c0_i32_0 = arith.constant 0 : i32
    %c0_i32_1 = arith.constant 0 : i32
    return %c0_i32, %c0_i32_0 : i32, i32
  }
  func.func @transform_4(%arg0: i32) -> (i32, i32) {
    %c0_i32 = arith.constant 0 : i32
    %c0_i32_0 = arith.constant 0 : i32
    %c0_i32_1 = arith.constant 0 : i32
    return %c0_i32, %c0_i32_0 : i32, i32
  }
  func.func @transform_5(%arg0: i32) -> (i32, i32) {
    %c0_i32 = arith.constant 0 : i32
    %c0_i32_0 = arith.constant 0 : i32
    return %arg0, %c0_i32 : i32, i32
  }
}

</mosaic_0001>

<bundles_post_ra>
// kernel: tpu_custom_call.1
= control target key start
LH: loop header
LB: loop body
LE: loop exit
PB: predicated region body
PF: predicated region fallthrough
CT: control target
= control target key end

     0   :  { %10 = vsyncpa [#allocation4], 0  ;;  %s392_s0 = inlined_call_operand.hbm [shape: f32[16,128], index: 0, kind: input, shape index: {}]   ;;  %s393_s1 = inlined_call_operand.hbm [shape: f32[128,128], index: 1, kind: input, shape index: {}]   ;;  %s394_s2 = inlined_call_operand.vmem [shape: f32[1,128], index: 2, kind: input, shape index: {}]   ;;  %s395_s3 = inlined_call_operand.hbm [shape: f32[128,128], index: 3, kind: input, shape index: {}]   ;;  %s396_s4 = inlined_call_operand.vmem [shape: f32[1,128], index: 4, kind: input, shape index: {}]   ;;  %s397_s5 = inlined_call_operand.hbm [shape: f32[16,128], index: 5, kind: output, shape index: {}]  }
   0x1   :  { %11 = vsyncpa [#allocation7], 0 }
   0x2   :  { %12 = vsyncpa [#allocation5], 0  ;;  %s30_s20 = sshll.u32 %s393_s1, 4  ;;  %s326_s21 = smov [#allocation6]   ;;  %s31_s20 = int_to_ptr.hbm [resolvable:$true] %s30_s20 }
   0x3   :  { %s32_s22 = sshll.u32 %s326_s21, 4  ;;  %s17_s25 = sshll.u32 %s392_s0, 4  ;;  %s33_s22 = int_to_ptr.vmem [resolvable:$true] %s32_s22  ;;  %s18_s25 = int_to_ptr.hbm [resolvable:$true] %s17_s25 }
   0x4   :  { %s327_s26 = smov 128   ;;  %s328_s27 = smov 8  }
   0x5   :  { %38 = dma.hbm_to_vmem [thread:$0]  %s31_s20, 2048, %s33_s22, [#allocation7], %s327_s26, %s327_s26, %s328_s27  }
   0x6   :  { %s329_s28 = smov [#allocation3]   ;;  %s45_s1 = sshll.u32 %s395_s3, 4  ;;  %s46_s1 = int_to_ptr.hbm [resolvable:$true] %s45_s1 }
   0x7   :  { %s19_s29 = sshll.u32 %s329_s28, 4  ;;  %s330_s0 = smov [#allocation8]   ;;  %s20_s29 = int_to_ptr.vmem [resolvable:$true] %s19_s29 }
   0x8   :  { %25 = dma.hbm_to_vmem [thread:$0]  %s18_s25, 256, %s20_s29, [#allocation4], %s327_s26, %s327_s26, %s328_s27  }
   0x9   :  { %s47_s7 = sshll.u32 %s330_s0, 4  ;;  %s48_s7 = int_to_ptr.vmem [resolvable:$true] %s47_s7 }
   0xa   :  { %53 = dma.hbm_to_vmem [thread:$0]  %s46_s1, 2048, %s48_s7, [#allocation7], %s327_s26, %s327_s26, %s328_s27  }
   0xb   :  { %320 = dma.done.wait [#allocation4], 256  }
   0xc   :  { %321 = vsyncadd [#allocation4], 4294967040 }
   0xd   :  { %322 = dma.done.wait [#allocation7], 4096  }
   0xe   :  { %323 = vsyncadd [#allocation7], 4294963200  ;;  %v85_v0 = vld [vmem:[#allocation6 + $0x78] sm:$0xff]  ;;  %v84_v1 = vld [vmem:[#allocation6 + $0x70] sm:$0xff]  ;;  %s331_s11 = smov [#allocation9]  }
   0xf   :  { %184 = vmatpush.msra.mxu2 %v85_v0  ;;  %90 = vmatpush.msra.mxu0 %v85_v0  ;;  %v83_v2 = vld [vmem:[#allocation6 + $0x68] sm:$0xff]  ;;  %v82_v3 = vld [vmem:[#allocation6 + $0x60] sm:$0xff]  ;;  %v81_v4 = vld [vmem:[#allocation6 + $0x58] sm:$0xff]  ;;  %s168_s12 = sshll.u32 %s331_s11, 4  ;;  %s169_s12 = int_to_ptr.vmem [resolvable:$true] %s168_s12 }
  0x10   :  { %v134_v5 = vld [vmem:[#allocation8 + $0x78] sm:$0xff]  ;;  %v133_v6 = vld [vmem:[#allocation8 + $0x70] sm:$0xff]  ;;  %v132_v8 = vld [vmem:[#allocation8 + $0x68] sm:$0xff] }
  0x11   :  { %185 = vmatpush.msra.mxu2 %v84_v1  ;;  %91 = vmatpush.msra.mxu0 %v84_v1  ;;  %v80_v7 = vld [vmem:[#allocation6 + $0x50] sm:$0xff]  ;;  %v79_v9 = vld [vmem:[#allocation6 + $0x48] sm:$0xff]  ;;  %v131_v10 = vld [vmem:[#allocation8 + $0x60] sm:$0xff] }
  0x12   :  { %200 = vmatpush.msra.mxu3 %v134_v5  ;;  %139 = vmatpush.msra.mxu1 %v134_v5  ;;  %v78_v11 = vld [vmem:[#allocation6 + $0x40] sm:$0xff]  ;;  %v130_v12 = vld [vmem:[#allocation8 + $0x58] sm:$0xff]  ;;  %v129_v14 = vld [vmem:[#allocation8 + $0x50] sm:$0xff] }
  0x13   :  { %186 = vmatpush.msra.mxu2 %v83_v2  ;;  %92 = vmatpush.msra.mxu0 %v83_v2  ;;  %v77_v13 = vld [vmem:[#allocation6 + $0x38] sm:$0xff]  ;;  %v76_v15 = vld [vmem:[#allocation6 + $0x30] sm:$0xff]  ;;  %v128_v16 = vld [vmem:[#allocation8 + $0x48] sm:$0xff] }
  0x14   :  { %201 = vmatpush.msra.mxu3 %v133_v6  ;;  %140 = vmatpush.msra.mxu1 %v133_v6  ;;  %v75_v17 = vld [vmem:[#allocation6 + $0x28] sm:$0xff]  ;;  %v127_v18 = vld [vmem:[#allocation8 + $0x40] sm:$0xff]  ;;  %v126_v20 = vld [vmem:[#allocation8 + $0x38] sm:$0xff] }
  0x15   :  { %187 = vmatpush.msra.mxu2 %v82_v3  ;;  %93 = vmatpush.msra.mxu0 %v82_v3  ;;  %v74_v19 = vld [vmem:[#allocation6 + $0x20] sm:$0xff]  ;;  %v73_v21 = vld [vmem:[#allocation6 + $0x18] sm:$0xff]  ;;  %v125_v22 = vld [vmem:[#allocation8 + $0x30] sm:$0xff] }
  0x16   :  { %202 = vmatpush.msra.mxu3 %v132_v8  ;;  %141 = vmatpush.msra.mxu1 %v132_v8  ;;  %v72_v23 = vld [vmem:[#allocation6 + $0x10] sm:$0xff]  ;;  %v124_v24 = vld [vmem:[#allocation8 + $0x28] sm:$0xff]  ;;  %v123_v26 = vld [vmem:[#allocation8 + $0x20] sm:$0xff] }
  0x17   :  { %188 = vmatpush.msra.mxu2 %v81_v4  ;;  %94 = vmatpush.msra.mxu0 %v81_v4  ;;  %v71_v25 = vld [vmem:[#allocation6 + $0x8] sm:$0xff]  ;;  %v70_v27 = vld [vmem:[#allocation6] sm:$0xff]  ;;  %v69_v28 = vld [vmem:[#allocation3 + $0x8] sm:$0xff] }
  0x18   :  { %203 = vmatpush.msra.mxu3 %v131_v10  ;;  %142 = vmatpush.msra.mxu1 %v131_v10  ;;  %v68_v29 = vld [vmem:[#allocation3] sm:$0xff]  ;;  %v122_v30 = vld [vmem:[#allocation8 + $0x18] sm:$0xff]  ;;  %v120_v32 = vld [vmem:[#allocation8 + $0x8] sm:$0xff] }
  0x19   :  { %189 = vmatpush.msra.mxu2 %v80_v7  ;;  %95 = vmatpush.msra.mxu0 %v80_v7  ;;  %v121_v31 = vld [vmem:[#allocation8 + $0x10] sm:$0xff]  ;;  %v119_v33 = vld [vmem:[#allocation8] sm:$0xff] }
  0x1a   :  { %204 = vmatpush.msra.mxu3 %v130_v12  ;;  %143 = vmatpush.msra.mxu1 %v130_v12  ;;  %v222_v34 = vld [vmem:[%s394_s2] ss:$0 sm:$0xff]  ;;  %s170_s2 = sshll.u32 %s397_s5, 4  ;;  %s171_s2 = int_to_ptr.hbm [resolvable:$true] %s170_s2 }
  0x1b   :  { %190 = vmatpush.msra.mxu2 %v79_v9  ;;  %96 = vmatpush.msra.mxu0 %v79_v9  ;;  %v223_v41 = vld [vmem:[%s396_s4] ss:$0 sm:$0xff] }
  0x1c   :  { %205 = vmatpush.msra.mxu3 %v129_v14  ;;  %144 = vmatpush.msra.mxu1 %v129_v14 }
  0x1d   :  { %191 = vmatpush.msra.mxu2 %v78_v11  ;;  %97 = vmatpush.msra.mxu0 %v78_v11 }
  0x1e   :  { %206 = vmatpush.msra.mxu3 %v128_v16  ;;  %145 = vmatpush.msra.mxu1 %v128_v16 }
  0x1f   :  { %192 = vmatpush.msra.mxu2 %v77_v13  ;;  %98 = vmatpush.msra.mxu0 %v77_v13 }
  0x20   :  { %207 = vmatpush.msra.mxu3 %v127_v18  ;;  %146 = vmatpush.msra.mxu1 %v127_v18 }
  0x21   :  { %193 = vmatpush.msra.mxu2 %v76_v15  ;;  %99 = vmatpush.msra.mxu0 %v76_v15 }
  0x22   :  { %208 = vmatpush.msra.mxu3 %v126_v20  ;;  %147 = vmatpush.msra.mxu1 %v126_v20 }
  0x23   :  { %194 = vmatpush.msra.mxu2 %v75_v17  ;;  %100 = vmatpush.msra.mxu0 %v75_v17 }
  0x24   :  { %209 = vmatpush.msra.mxu3 %v125_v22  ;;  %148 = vmatpush.msra.mxu1 %v125_v22 }
  0x25   :  { %195 = vmatpush.msra.mxu2 %v74_v19  ;;  %101 = vmatpush.msra.mxu0 %v74_v19 }
  0x26   :  { %210 = vmatpush.msra.mxu3 %v124_v24  ;;  %149 = vmatpush.msra.mxu1 %v124_v24 }
  0x27   :  { %196 = vmatpush.msra.mxu2 %v73_v21  ;;  %102 = vmatpush.msra.mxu0 %v73_v21 }
  0x28   :  { %211 = vmatpush.msra.mxu3 %v123_v26  ;;  %150 = vmatpush.msra.mxu1 %v123_v26 }
  0x29   :  { %197 = vmatpush.msra.mxu2 %v72_v23  ;;  %103 = vmatpush.msra.mxu0 %v72_v23 }
  0x2a   :  { %212 = vmatpush.msra.mxu3 %v122_v30  ;;  %151 = vmatpush.msra.mxu1 %v122_v30 }
  0x2b   :  { %198 = vmatpush.msra.mxu2 %v71_v25  ;;  %104 = vmatpush.msra.mxu0 %v71_v25 }
  0x2c   :  { %213 = vmatpush.msra.mxu3 %v121_v31  ;;  %152 = vmatpush.msra.mxu1 %v121_v31 }
  0x2d   :  { %199 = vmatpush.msra.mxu2 %v70_v27  ;;  %105 = vmatpush.msra.mxu0 %v70_v27 }
  0x2e   :  { %109 = vmatmul.f32.vlgmr.msra.gmra.mxu2 %v69_v28  ;;  %106 = vmatmul.f32.vlgmr.msra.gmra.mxu0 %v68_v29 }
  0x2f   :  { %214 = vmatpush.msra.mxu3 %v120_v32  ;;  %153 = vmatpush.msra.mxu1 %v120_v32 }
  0x31   :  { %215 = vmatpush.msra.mxu3 %v119_v33  ;;  %154 = vmatpush.msra.mxu1 %v119_v33 }
  0xab   :  { %v107_v35 = vpop.f32.mrf.mxu0 }
  0xac   :  { %v108_v36 = vadd.f32 %v222_v34, %v107_v35 }
  0xae   :  { %v113_v37 = vmax.f32 %v108_v36, 0.0 }
  0xb0   :  { %155 = vmatmul.f32.vlgmr.msra.gmra.mxu1 %v113_v37 }
  0xb1   :  { %v110_v38 = vpop.f32.mrf.mxu2 }
  0xb2   :  { %v111_v39 = vadd.f32 %v222_v34, %v110_v38 }
  0xb4   :  { %v114_v40 = vmax.f32 %v111_v39, 0.0 }
  0xb6   :  { %158 = vmatmul.f32.vlgmr.msra.gmra.mxu3 %v114_v40 }
 0x12d   :  { %v156_v42 = vpop.f32.mrf.mxu1 }
 0x12e   :  { %v157_v43 = vadd.f32 %v223_v41, %v156_v42 }
 0x130   :  { %162 = vst [vmem:[#allocation9] sm:$0xff] %v157_v43 }
 0x139   :  { %v159_v44 = vpop.f32.mrf.mxu3 }
 0x13a   :  { %v160_v45 = vadd.f32 %v223_v41, %v159_v44 }
 0x13c   :  { %163 = vst [vmem:[#allocation9 + $0x8] sm:$0xff] %v160_v45 }
 0x13d   :  { %176 = dma.vmem_to_hbm [thread:$0]  %s169_s12, 256, %s171_s2, [#allocation5], %s327_s26, %s327_s26, %s328_s27  }
 0x13e   :  { %324 = dma.done.wait [#allocation5], 256  }
 0x13f   :  { %325 = vsyncadd [#allocation5], 4294967040 }
 0x140   :  { %181 = vsyncpa [#allocation4], 1 }
 0x141   :  { %182 = vsyncpa [#allocation7], 1 }
 0x142   :  { %183 = vsyncpa [#allocation5], 1 }

</bundles_post_ra>
